<compile_context>
chip_gen: v7x
topology: tpu7x:2x2x1
jax: 0.10.0
libtpu: 0.0.40
codegen_flags: <defaults>
</compile_context>

<pallas_src>
import functools

import numpy as np
import jax
import jax.numpy as jnp
from jax import lax
from jax.experimental import pallas as pl
from jax.experimental.pallas import tpu as pltpu

NUM_CLASSES = 4
MARGIN_POS = 0.3   # unused in forward (matches the PyTorch module)
MARGIN_NEG = 0.3
THRESHOLD = 0.8
EPS = 1e-8         # CosineSimilarity eps


def _centroid_loss_kernel(preds_ref, labels_ref, out_ref,
                          cent_acc, cnt_acc, gram_acc, cnorm2_acc, loss_acc,
                          *, margin_neg, threshold, batch, padded):
    f32 = jnp.float32
    phase = pl.program_id(0)
    b = pl.program_id(1)
    nb = pl.num_programs(1)

    preds = preds_ref[...].astype(f32)      # (TB, D)  upcast once, stay f32
    labels = labels_ref[...].astype(f32)    # (TB, C)
    tb = preds.shape[0]
    C = labels.shape[1]

    # ---------------- phase 0: centroid accumulation (append) ----------------
    @pl.when(phase == 0)
    def _phase0():
        @pl.when(b == 0)
        def _init():
            cent_acc[...] = jnp.zeros_like(cent_acc)
            cnt_acc[...] = jnp.zeros_like(cnt_acc)
            loss_acc[...] = jnp.zeros_like(loss_acc)

        thr_mask = (labels >= threshold).astype(f32)                   # (TB, C)
        # counts via a plain cross-sublane reduction (no degenerate N=1 matmul)
        cnt_acc[...] += jnp.sum(thr_mask, axis=0, keepdims=True)       # (1, C)
        # raw centroid sums: the one genuinely MXU-shaped op of this phase
        cent_acc[...] += lax.dot_general(
            thr_mask, preds, (((0,), (0,)), ((), ())),
            preferred_element_type=f32)                                # (C, D)

    # ---------------- phase 1: distances + loss ------------------------------
    @pl.when(phase == 1)
    def _phase1():
        counts = cnt_acc[...]                                          # (1, C)
        # exact tiny divide (C elems, once per tile) so centroid scaling is full precision
        inv_cnt = 1.0 / jnp.maximum(counts, 1.0)                       # (1, C)
        has_c = counts > 0.0                                           # (1, C) bool

        @pl.when(b == 0)
        def _finalize_centroid_stats():
            s = cent_acc[...]                                          # (C, D) raw sums
            g = lax.dot_general(s, s, (((1,), (1,)), ((), ())),
                                preferred_element_type=f32)            # (C, C) Gram
            gram_acc[...] = g
            ii = lax.broadcasted_iota(jnp.int32, (C, C), 0)
            jj = lax.broadcasted_iota(jnp.int32, (C, C), 1)
            diag = jnp.sum(jnp.where(ii == jj, g, 0.0), axis=0, keepdims=True)  # (1, C)
            cnorm2_acc[...] = diag * inv_cnt * inv_cnt                 # ||centroid_c||^2

        # the single O(TB*C*D) MXU matmul; reused for positive and negative terms
        dots = lax.dot_general(preds, cent_acc[...], (((1,), (1,)), ((), ())),
                               preferred_element_type=f32) * inv_cnt   # (TB, C) preds.centroid_c
        pred_ss = jnp.sum(preds * preds, axis=1, keepdims=True)        # (TB, 1)

        # ---- dist_positive: cos(pred, sum_c label_c * centroid_c) -----------
        w = labels * inv_cnt                                           # (TB, C)
        pc_dot = jnp.sum(labels * dots, axis=1, keepdims=True)         # (TB, 1) preds . cmb
        g = gram_acc[...]                                              # (C, C)
        t = jnp.zeros_like(w)
        for c in range(C):          # static unroll; VPU outer-product FMAs (C is tiny)
            t = t + w[:, c:c + 1] * g[c:c + 1, :]
        cmb_ss = jnp.sum(t * w, axis=1, keepdims=True)                 # (TB, 1) ||cmb||^2
        # cos = dot / max(|a||b|, eps) == dot * rsqrt(max(|a|^2|b|^2, eps^2))  -> EUP
        cos_pos = pc_dot * lax.rsqrt(jnp.maximum(pred_ss * cmb_ss, EPS * EPS))
        pos = 1.0 - cos_pos                                            # (TB, 1)

        # ---- dist_negative: hinge over existing centroids with label < 1-thr -
        inv_norm = lax.rsqrt(jnp.maximum(pred_ss * cnorm2_acc[...], EPS * EPS))  # (TB, C)
        dist_neg = 1.0 - dots * inv_norm
        hinge = jnp.maximum(margin_neg - dist_neg, 0.0)                # (TB, C)
        neg_mask = jnp.logical_and(labels < 1.0 - threshold, has_c).astype(f32)
        adds = jnp.sum(neg_mask, axis=1, keepdims=True)                # (TB, 1)
        # guard adds == 0 (PyTorch would divide by zero); EUP approx reciprocal
        neg = (jnp.sum(neg_mask * hinge, axis=1, keepdims=True)
               * pl.reciprocal(jnp.maximum(adds, 1.0), approx=True))   # (TB, 1)

        contrib = pos + neg
        if padded:  # static flag: mask rows added by batch padding
            row = b * tb + lax.broadcasted_iota(jnp.int32, (tb, 1), 0)
            contrib = jnp.where(row < batch, contrib, 0.0)
        loss_acc[...] += jnp.sum(contrib, axis=0, keepdims=True)       # (1, 1)

        @pl.when(b == nb - 1)
        def _write():
            # mean(pos) + mean(neg) = (sum(pos) + sum(neg)) / B ; 1/B folded statically
            out_ref[...] = loss_acc[...] * (1.0 / batch)


def _round_up(x, m):
    return (x + m - 1) // m * m


def centroid_loss(preds, labels, *, margin_neg=MARGIN_NEG, threshold=THRESHOLD,
                  block_rows=512):
    """Pallas TPU implementation of CentroidLoss.forward (reset=True).

    block_rows: B-tile size. 512 targets v5e/v6e VMEM budgets; use ~256 on
    v7x (64 MiB VMEM) when D is large.
    """
    B, D = preds.shape
    _, C = labels.shape

    # choose a B-tile: multiple of 8 sublanes, capped at block_rows
    tb = min(_round_up(B, 8), _round_up(block_rows, 8))
    b_pad = _round_up(B, tb)
    padded = b_pad != B
    if padded:
        preds = jnp.pad(preds, ((0, b_pad - B), (0, 0)))
        labels = jnp.pad(labels, ((0, b_pad - B), (0, 0)))
    nb = b_pad // tb

    # inputs are DMA'd at native dtype (e.g. bf16) and upcast in-kernel
    in_bytes = tb * D * preds.dtype.itemsize + tb * C * labels.dtype.itemsize
    scratch_bytes = 4 * (C * D + C * C + 2 * C + 1)
    vmem_limit = int(min(max(4 * in_bytes + scratch_bytes + (4 << 20), 16 << 20), 40 << 20))

    kernel = functools.partial(_centroid_loss_kernel,
                               margin_neg=float(margin_neg),
                               threshold=float(threshold),
                               batch=B, padded=padded)
    out = pl.pallas_call(
        kernel,
        out_shape=jax.ShapeDtypeStruct((1, 1), jnp.float32),
        grid=(2, nb),                            # (phase, B-tile), both sequential
        in_specs=[
            pl.BlockSpec((tb, D), lambda p, i: (i, 0)),
            pl.BlockSpec((tb, C), lambda p, i: (i, 0)),
        ],
        out_specs=pl.BlockSpec((1, 1), lambda p, i: (0, 0)),
        scratch_shapes=[
            pltpu.VMEM((C, D), jnp.float32),     # raw centroid sums
            pltpu.VMEM((1, C), jnp.float32),     # per-class counts
            pltpu.VMEM((C, C), jnp.float32),     # Gram of raw sums
            pltpu.VMEM((1, C), jnp.float32),     # squared centroid norms
            pltpu.VMEM((1, 1), jnp.float32),     # running loss sum
        ],
        compiler_params=pltpu.CompilerParams(
            dimension_semantics=("arbitrary", "arbitrary"),
            vmem_limit_bytes=vmem_limit),
    )(preds, labels)
    return out[0, 0]


# ----------------------------- pure-python reference ------------------------
def _reference_loss(preds, labels, margin_neg=MARGIN_NEG, threshold=THRESHOLD):
    """Mirrors the PyTorch loops (running-mean append, per-row dist loops)."""
    preds = np.asarray(preds, np.float64)
    labels = np.asarray(labels, np.float64)
    B, _ = preds.shape
    centroids, counters = {}, {}
    rows, cols = np.where(labels >= threshold)
    for r, c in zip(rows, cols):
        c = int(c)
        if c not in centroids:
            centroids[c] = preds[r].copy()
            counters[c] = 1
        else:
            k = counters[c]
            centroids[c] = k / (k + 1) * centroids[c] + 1.0 / (k + 1) * preds[r]
            counters[c] = k + 1

    def cos(a, b):
        return float(np.dot(a, b) / max(np.linalg.norm(a) * np.linalg.norm(b), EPS))

    pos, neg = [], []
    for r in range(B):
        idx = np.where(labels[r] > 0)[0].tolist()
        cmb = labels[r, idx[0]] * centroids[idx[0]]
        for i in idx[1:]:
            cmb = cmb + labels[r, i] * centroids[i]
        pos.append(1.0 - cos(preds[r], cmb))

        keys = set(np.where(labels[r] < 1.0 - threshold)[0].tolist())
        total, adds = 0.0, 0
        for ck in centroids:
            if ck in keys:
                adds += 1
                dist = 1.0 - cos(preds[r], centroids[ck])
                total += max(margin_neg - dist, 0.0)
        neg.append(total / adds)
    return float(np.mean(pos) + np.mean(neg))


if __name__ == "__main__":
    key = jax.random.PRNGKey(0)
    B, C, D = 8, NUM_CLASSES, 32

    preds = jax.random.normal(key, (B, D), dtype=jnp.float32)

    # Soft multi-labels: each row has one "hot" class (0.9 >= threshold) and
    # small values (0.05) elsewhere, so every class gets a centroid and every
    # row has both positive and negative classes (matching the module's
    # implicit assumptions — otherwise the PyTorch code would KeyError).
    hot = np.arange(B) % C
    labels_np = np.full((B, C), 0.05, dtype=np.float32)
    labels_np[np.arange(B), hot] = 0.9
    labels = jnp.asarray(labels_np)

    loss = jax.block_until_ready(centroid_loss(preds, labels))

    ref = _reference_loss(np.asarray(preds), labels_np)
    np.testing.assert_allclose(float(loss), ref, rtol=1e-3, atol=1e-3)

    # TODO(synk): stateful centroid carry-over across calls (reset=False path) is
    # not expressible in a single stateless kernel; only the reset=True forward is implemented.
    print("KERNEL_OK")
</pallas_src>

<mosaic_0001>
module attributes {stable_mosaic.version = 11 : i64} {
  func.func @_centroid_loss_kernel(%arg0: i32, %arg1: i32, %arg2: memref<8x32xf32, #tpu.memory_space<vmem>>, %arg3: memref<8x4xf32, #tpu.memory_space<vmem>>, %arg4: memref<1x1xf32, #tpu.memory_space<vmem>>, %arg5: memref<4x32xf32, #tpu.memory_space<vmem>>, %arg6: memref<1x4xf32, #tpu.memory_space<vmem>>, %arg7: memref<4x4xf32, #tpu.memory_space<vmem>>, %arg8: memref<1x4xf32, #tpu.memory_space<vmem>>, %arg9: memref<1x1xf32, #tpu.memory_space<vmem>>) attributes {dimension_semantics = [#tpu.dimension_semantics<arbitrary>, #tpu.dimension_semantics<arbitrary>], iteration_bounds = array<i64: 2, 1>, scalar_prefetch = 0 : i64, scratch_operands = 5 : i64, tpu.core_type = #tpu.core_type<tc>, window_params = [{transform_indices = @transform_0, window_bounds = array<i64: 8, 32>}, {transform_indices = @transform_1, window_bounds = array<i64: 8, 4>}, {pipeline_mode = #tpu.pipeline_mode<synchronous>, transform_indices = @transform_2, window_bounds = array<i64: 1, 1>}]} {
    %c0 = arith.constant 0 : index
    %c0_0 = arith.constant 0 : index
    %0 = vector.load %arg2[%c0, %c0_0] : memref<8x32xf32, #tpu.memory_space<vmem>>, vector<8x32xf32>
    %c0_1 = arith.constant 0 : index
    %c0_2 = arith.constant 0 : index
    %1 = vector.load %arg3[%c0_1, %c0_2] : memref<8x4xf32, #tpu.memory_space<vmem>>, vector<8x4xf32>
    %c0_i32 = arith.constant 0 : i32
    %2 = arith.cmpi eq, %arg0, %c0_i32 : i32
    %3 = arith.extui %2 : i1 to i32
    %c0_i32_3 = arith.constant 0 : i32
    %4 = arith.cmpi ne, %3, %c0_i32_3 : i32
    scf.if %4 {
      %c0_i32_5 = arith.constant 0 : i32
      %8 = arith.cmpi eq, %arg1, %c0_i32_5 : i32
      %9 = arith.extui %8 : i1 to i32
      %c0_i32_6 = arith.constant 0 : i32
      %10 = arith.cmpi ne, %9, %c0_i32_6 : i32
      scf.if %10 {
        %cst_17 = arith.constant 0.000000e+00 : f32
        %24 = vector.broadcast %cst_17 : f32 to vector<4x32xf32>
        %c0_18 = arith.constant 0 : index
        %c0_19 = arith.constant 0 : index
        %25 = vector.load %arg5[%c0_18, %c0_19] : memref<4x32xf32, #tpu.memory_space<vmem>>, vector<4x32xf32>
        tpu.vector_store %arg5[%c0_18, %c0_19], %24 {strides = array<i32>} : memref<4x32xf32, #tpu.memory_space<vmem>>, vector<4x32xf32>,
        %cst_20 = arith.constant 0.000000e+00 : f32
        %26 = vector.broadcast %cst_20 : f32 to vector<1x4xf32>
        %c0_21 = arith.constant 0 : index
        %c0_22 = arith.constant 0 : index
        %27 = vector.load %arg6[%c0_21, %c0_22] : memref<1x4xf32, #tpu.memory_space<vmem>>, vector<1x4xf32>
        tpu.vector_store %arg6[%c0_21, %c0_22], %26 {strides = array<i32>} : memref<1x4xf32, #tpu.memory_space<vmem>>, vector<1x4xf32>,
        %cst_23 = arith.constant 0.000000e+00 : f32
        %28 = vector.broadcast %cst_23 : f32 to vector<1x1xf32>
        %c0_24 = arith.constant 0 : index
        %c0_25 = arith.constant 0 : index
        %29 = vector.load %arg9[%c0_24, %c0_25] : memref<1x1xf32, #tpu.memory_space<vmem>>, vector<1x1xf32>
        tpu.vector_store %arg9[%c0_24, %c0_25], %28 {strides = array<i32>} : memref<1x1xf32, #tpu.memory_space<vmem>>, vector<1x1xf32>,
      } else {
      }
      %cst = arith.constant 8.000000e-01 : f32
      %11 = vector.broadcast %cst : f32 to vector<8x4xf32>
      %12 = arith.cmpf oge, %1, %11 : vector<8x4xf32>
      %13 = arith.extui %12 : vector<8x4xi1> to vector<8x4xi32>
      %14 = arith.sitofp %13 : vector<8x4xi32> to vector<8x4xf32>
      %c0_7 = arith.constant 0 : index
      %c0_8 = arith.constant 0 : index
      %15 = vector.load %arg6[%c0_7, %c0_8] : memref<1x4xf32, #tpu.memory_space<vmem>>, vector<1x4xf32>
      %cst_9 = arith.constant dense<0.000000e+00> : vector<4xf32>
      %16 = vector.multi_reduction <add>, %14, %cst_9 [0] : vector<8x4xf32> to vector<4xf32>
      %17 = vector.shape_cast %16 : vector<4xf32> to vector<1x4xf32>
      %18 = arith.addf %15, %17 : vector<1x4xf32>
      %c0_10 = arith.constant 0 : index
      %c0_11 = arith.constant 0 : index
      %19 = vector.load %arg6[%c0_10, %c0_11] : memref<1x4xf32, #tpu.memory_space<vmem>>, vector<1x4xf32>
      tpu.vector_store %arg6[%c0_10, %c0_11], %18 {strides = array<i32>} : memref<1x4xf32, #tpu.memory_space<vmem>>, vector<1x4xf32>,
      %c0_12 = arith.constant 0 : index
      %c0_13 = arith.constant 0 : index
      %20 = vector.load %arg5[%c0_12, %c0_13] : memref<4x32xf32, #tpu.memory_space<vmem>>, vector<4x32xf32>
      %cst_14 = arith.constant dense<0.000000e+00> : vector<4x32xf32>
      %21 = tpu.matmul %14, %0, %cst_14 {dimension_numbers = #tpu.dot_dimension_numbers<[0], [0], [1], [1], [0, 1, 1, 1], [], []>} : vector<8x4xf32>, vector<8x32xf32>, vector<4x32xf32> -> vector<4x32xf32>
      %22 = arith.addf %20, %21 : vector<4x32xf32>
      %c0_15 = arith.constant 0 : index
      %c0_16 = arith.constant 0 : index
      %23 = vector.load %arg5[%c0_15, %c0_16] : memref<4x32xf32, #tpu.memory_space<vmem>>, vector<4x32xf32>
      tpu.vector_store %arg5[%c0_15, %c0_16], %22 {strides = array<i32>} : memref<4x32xf32, #tpu.memory_space<vmem>>, vector<4x32xf32>,
    } else {
    }
    %c1_i32 = arith.constant 1 : i32
    %5 = arith.cmpi eq, %arg0, %c1_i32 : i32
    %6 = arith.extui %5 : i1 to i32
    %c0_i32_4 = arith.constant 0 : i32
    %7 = arith.cmpi ne, %6, %c0_i32_4 : i32
    scf.if %7 {
      %c0_5 = arith.constant 0 : index
      %c0_6 = arith.constant 0 : index
      %8 = vector.load %arg6[%c0_5, %c0_6] : memref<1x4xf32, #tpu.memory_space<vmem>>, vector<1x4xf32>
      %cst = arith.constant 1.000000e+00 : f32
      %9 = vector.broadcast %cst : f32 to vector<1x4xf32>
      %10 = arith.maximumf %8, %9 : vector<1x4xf32>
      %cst_7 = arith.constant 1.000000e+00 : f32
      %11 = vector.broadcast %cst_7 : f32 to vector<1x4xf32>
      %12 = arith.divf %11, %10 : vector<1x4xf32>
      %cst_8 = arith.constant 0.000000e+00 : f32
      %13 = vector.broadcast %cst_8 : f32 to vector<1x4xf32>
      %14 = arith.cmpf ogt, %8, %13 : vector<1x4xf32>
      %c0_i32_9 = arith.constant 0 : i32
      %15 = arith.cmpi eq, %arg1, %c0_i32_9 : i32
      %16 = arith.extui %15 : i1 to i32
      %c0_i32_10 = arith.constant 0 : i32
      %17 = arith.cmpi ne, %16, %c0_i32_10 : i32
      scf.if %17 {
        %c0_39 = arith.constant 0 : index
        %c0_40 = arith.constant 0 : index
        %104 = vector.load %arg5[%c0_39, %c0_40] : memref<4x32xf32, #tpu.memory_space<vmem>>, vector<4x32xf32>
        %cst_41 = arith.constant dense<0.000000e+00> : vector<4x4xf32>
        %105 = tpu.matmul %104, %104, %cst_41 {dimension_numbers = #tpu.dot_dimension_numbers<[1], [1], [0], [0], [0, 0, 1, 0], [], []>} : vector<4x32xf32>, vector<4x32xf32>, vector<4x4xf32> -> vector<4x4xf32>
        %c0_42 = arith.constant 0 : index
        %c0_43 = arith.constant 0 : index
        %106 = vector.load %arg7[%c0_42, %c0_43] : memref<4x4xf32, #tpu.memory_space<vmem>>, vector<4x4xf32>
        tpu.vector_store %arg7[%c0_42, %c0_43], %105 {strides = array<i32>} : memref<4x4xf32, #tpu.memory_space<vmem>>, vector<4x4xf32>,
        %107 = tpu.iota {dimensions = array<i32: 0>} : vector<4x4xi32>
        %108 = tpu.iota {dimensions = array<i32: 1>} : vector<4x4xi32>
        %109 = arith.cmpi eq, %107, %108 : vector<4x4xi32>
        %cst_44 = arith.constant 0.000000e+00 : f32
        %110 = vector.broadcast %cst_44 : f32 to vector<4x4xf32>
        %111 = arith.select %109, %105, %110 : vector<4x4xi1>, vector<4x4xf32>
        %cst_45 = arith.constant dense<0.000000e+00> : vector<4xf32>
        %112 = vector.multi_reduction <add>, %111, %cst_45 [0] : vector<4x4xf32> to vector<4xf32>
        %113 = vector.shape_cast %112 : vector<4xf32> to vector<1x4xf32>
        %114 = arith.mulf %113, %12 : vector<1x4xf32>
        %115 = arith.mulf %114, %12 : vector<1x4xf32>
        %c0_46 = arith.constant 0 : index
        %c0_47 = arith.constant 0 : index
        %116 = vector.load %arg8[%c0_46, %c0_47] : memref<1x4xf32, #tpu.memory_space<vmem>>, vector<1x4xf32>
        tpu.vector_store %arg8[%c0_46, %c0_47], %115 {strides = array<i32>} : memref<1x4xf32, #tpu.memory_space<vmem>>, vector<1x4xf32>,
      } else {
      }
      %c0_11 = arith.constant 0 : index
      %c0_12 = arith.constant 0 : index
      %18 = vector.load %arg5[%c0_11, %c0_12] : memref<4x32xf32, #tpu.memory_space<vmem>>, vector<4x32xf32>
      %cst_13 = arith.constant dense<0.000000e+00> : vector<8x4xf32>
      %19 = tpu.matmul %0, %18, %cst_13 {dimension_numbers = #tpu.dot_dimension_numbers<[1], [1], [0], [0], [0, 0, 1, 0], [], []>} : vector<8x32xf32>, vector<4x32xf32>, vector<8x4xf32> -> vector<8x4xf32>
      %20 = vector.broadcast %12 : vector<1x4xf32> to vector<8x4xf32>
      %21 = arith.mulf %19, %20 : vector<8x4xf32>
      %22 = arith.mulf %0, %0 : vector<8x32xf32>
      %cst_14 = arith.constant dense<0.000000e+00> : vector<8xf32>
      %23 = vector.multi_reduction <add>, %22, %cst_14 [1] : vector<8x32xf32> to vector<8xf32>
      %24 = vector.shape_cast %23 : vector<8xf32> to vector<8x1xf32>
      %25 = vector.broadcast %12 : vector<1x4xf32> to vector<8x4xf32>
      %26 = arith.mulf %1, %25 : vector<8x4xf32>
      %27 = arith.mulf %1, %21 : vector<8x4xf32>
      %cst_15 = arith.constant dense<0.000000e+00> : vector<8xf32>
      %28 = vector.multi_reduction <add>, %27, %cst_15 [1] : vector<8x4xf32> to vector<8xf32>
      %29 = vector.shape_cast %28 : vector<8xf32> to vector<8x1xf32>
      %c0_16 = arith.constant 0 : index
      %c0_17 = arith.constant 0 : index
      %30 = vector.load %arg7[%c0_16, %c0_17] : memref<4x4xf32, #tpu.memory_space<vmem>>, vector<4x4xf32>
      %cst_18 = arith.constant 0.000000e+00 : f32
      %31 = vector.broadcast %cst_18 : f32 to vector<8x4xf32>
      %32 = vector.extract_strided_slice %26 {offsets = [0, 0], sizes = [8, 1], strides = [1, 1]} : vector<8x4xf32> to vector<8x1xf32>
      %33 = vector.extract_strided_slice %30 {offsets = [0, 0], sizes = [1, 4], strides = [1, 1]} : vector<4x4xf32> to vector<1x4xf32>
      %34 = vector.broadcast %32 : vector<8x1xf32> to vector<8x4xf32>
      %35 = vector.broadcast %33 : vector<1x4xf32> to vector<8x4xf32>
      %36 = arith.mulf %34, %35 : vector<8x4xf32>
      %37 = arith.addf %31, %36 : vector<8x4xf32>
      %38 = vector.extract_strided_slice %26 {offsets = [0, 1], sizes = [8, 1], strides = [1, 1]} : vector<8x4xf32> to vector<8x1xf32>
      %39 = vector.extract_strided_slice %30 {offsets = [1, 0], sizes = [1, 4], strides = [1, 1]} : vector<4x4xf32> to vector<1x4xf32>
      %40 = vector.broadcast %38 : vector<8x1xf32> to vector<8x4xf32>
      %41 = vector.broadcast %39 : vector<1x4xf32> to vector<8x4xf32>
      %42 = arith.mulf %40, %41 : vector<8x4xf32>
      %43 = arith.addf %37, %42 : vector<8x4xf32>
      %44 = vector.extract_strided_slice %26 {offsets = [0, 2], sizes = [8, 1], strides = [1, 1]} : vector<8x4xf32> to vector<8x1xf32>
      %45 = vector.extract_strided_slice %30 {offsets = [2, 0], sizes = [1, 4], strides = [1, 1]} : vector<4x4xf32> to vector<1x4xf32>
      %46 = vector.broadcast %44 : vector<8x1xf32> to vector<8x4xf32>
      %47 = vector.broadcast %45 : vector<1x4xf32> to vector<8x4xf32>
      %48 = arith.mulf %46, %47 : vector<8x4xf32>
      %49 = arith.addf %43, %48 : vector<8x4xf32>
      %50 = vector.extract_strided_slice %26 {offsets = [0, 3], sizes = [8, 1], strides = [1, 1]} : vector<8x4xf32> to vector<8x1xf32>
      %51 = vector.extract_strided_slice %30 {offsets = [3, 0], sizes = [1, 4], strides = [1, 1]} : vector<4x4xf32> to vector<1x4xf32>
      %52 = vector.broadcast %50 : vector<8x1xf32> to vector<8x4xf32>
      %53 = vector.broadcast %51 : vector<1x4xf32> to vector<8x4xf32>
      %54 = arith.mulf %52, %53 : vector<8x4xf32>
      %55 = arith.addf %49, %54 : vector<8x4xf32>
      %56 = arith.mulf %55, %26 : vector<8x4xf32>
      %cst_19 = arith.constant dense<0.000000e+00> : vector<8xf32>
      %57 = vector.multi_reduction <add>, %56, %cst_19 [1] : vector<8x4xf32> to vector<8xf32>
      %58 = vector.shape_cast %57 : vector<8xf32> to vector<8x1xf32>
      %59 = arith.mulf %24, %58 : vector<8x1xf32>
      %cst_20 = arith.constant 1.000000e-16 : f32
      %60 = vector.broadcast %cst_20 : f32 to vector<8x1xf32>
      %61 = arith.maximumf %59, %60 : vector<8x1xf32>
      %62 = math.rsqrt %61 : vector<8x1xf32>
      %63 = arith.mulf %29, %62 : vector<8x1xf32>
      %cst_21 = arith.constant 1.000000e+00 : f32
      %64 = vector.broadcast %cst_21 : f32 to vector<8x1xf32>
      %65 = arith.subf %64, %63 : vector<8x1xf32>
      %c0_22 = arith.constant 0 : index
      %c0_23 = arith.constant 0 : index
      %66 = vector.load %arg8[%c0_22, %c0_23] : memref<1x4xf32, #tpu.memory_space<vmem>>, vector<1x4xf32>
      %67 = vector.broadcast %24 : vector<8x1xf32> to vector<8x4xf32>
      %68 = vector.broadcast %66 : vector<1x4xf32> to vector<8x4xf32>
      %69 = arith.mulf %67, %68 : vector<8x4xf32>
      %cst_24 = arith.constant 1.000000e-16 : f32
      %70 = vector.broadcast %cst_24 : f32 to vector<8x4xf32>
      %71 = arith.maximumf %69, %70 : vector<8x4xf32>
      %72 = math.rsqrt %71 : vector<8x4xf32>
      %73 = arith.mulf %21, %72 : vector<8x4xf32>
      %cst_25 = arith.constant 1.000000e+00 : f32
      %74 = vector.broadcast %cst_25 : f32 to vector<8x4xf32>
      %75 = arith.subf %74, %73 : vector<8x4xf32>
      %cst_26 = arith.constant 3.000000e-01 : f32
      %76 = vector.broadcast %cst_26 : f32 to vector<8x4xf32>
      %77 = arith.subf %76, %75 : vector<8x4xf32>
      %cst_27 = arith.constant 0.000000e+00 : f32
      %78 = vector.broadcast %cst_27 : f32 to vector<8x4xf32>
      %79 = arith.maximumf %77, %78 : vector<8x4xf32>
      %cst_28 = arith.constant 2.000000e-01 : f32
      %80 = vector.broadcast %cst_28 : f32 to vector<8x4xf32>
      %81 = arith.cmpf olt, %1, %80 : vector<8x4xf32>
      %82 = vector.broadcast %14 : vector<1x4xi1> to vector<8x4xi1>
      %83 = arith.andi %81, %82 : vector<8x4xi1>
      %84 = arith.extui %83 : vector<8x4xi1> to vector<8x4xi32>
      %85 = arith.sitofp %84 : vector<8x4xi32> to vector<8x4xf32>
      %cst_29 = arith.constant dense<0.000000e+00> : vector<8xf32>
      %86 = vector.multi_reduction <add>, %85, %cst_29 [1] : vector<8x4xf32> to vector<8xf32>
      %87 = vector.shape_cast %86 : vector<8xf32> to vector<8x1xf32>
      %88 = arith.mulf %85, %79 : vector<8x4xf32>
      %cst_30 = arith.constant dense<0.000000e+00> : vector<8xf32>
      %89 = vector.multi_reduction <add>, %88, %cst_30 [1] : vector<8x4xf32> to vector<8xf32>
      %90 = vector.shape_cast %89 : vector<8xf32> to vector<8x1xf32>
      %cst_31 = arith.constant 1.000000e+00 : f32
      %91 = vector.broadcast %cst_31 : f32 to vector<8x1xf32>
      %92 = arith.maximumf %87, %91 : vector<8x1xf32>
      %93 = tpu.reciprocal %92 {approx = true} : vector<8x1xf32> -> vector<8x1xf32>
      %94 = arith.mulf %90, %93 : vector<8x1xf32>
      %95 = arith.addf %65, %94 : vector<8x1xf32>
      %c0_32 = arith.constant 0 : index
      %c0_33 = arith.constant 0 : index
      %96 = vector.load %arg9[%c0_32, %c0_33] : memref<1x1xf32, #tpu.memory_space<vmem>>, vector<1x1xf32>
      %cst_34 = arith.constant dense<0.000000e+00> : vector<1xf32>
      %97 = vector.multi_reduction <add>, %95, %cst_34 [0] : vector<8x1xf32> to vector<1xf32>
      %98 = vector.shape_cast %97 : vector<1xf32> to vector<1x1xf32>
      %99 = arith.addf %96, %98 : vector<1x1xf32>
      %c0_35 = arith.constant 0 : index
      %c0_36 = arith.constant 0 : index
      %100 = vector.load %arg9[%c0_35, %c0_36] : memref<1x1xf32, #tpu.memory_space<vmem>>, vector<1x1xf32>
      tpu.vector_store %arg9[%c0_35, %c0_36], %99 {strides = array<i32>} : memref<1x1xf32, #tpu.memory_space<vmem>>, vector<1x1xf32>,
      %c0_i32_37 = arith.constant 0 : i32
      %101 = arith.cmpi eq, %arg1, %c0_i32_37 : i32
      %102 = arith.extui %101 : i1 to i32
      %c0_i32_38 = arith.constant 0 : i32
      %103 = arith.cmpi ne, %102, %c0_i32_38 : i32
      scf.if %103 {
        %c0_39 = arith.constant 0 : index
        %c0_40 = arith.constant 0 : index
        %104 = vector.load %arg9[%c0_39, %c0_40] : memref<1x1xf32, #tpu.memory_space<vmem>>, vector<1x1xf32>
        %cst_41 = arith.constant 1.250000e-01 : f32
        %105 = vector.broadcast %cst_41 : f32 to vector<1x1xf32>
        %106 = arith.mulf %104, %105 : vector<1x1xf32>
        %c0_42 = arith.constant 0 : index
        %c0_43 = arith.constant 0 : index
        %107 = vector.load %arg4[%c0_42, %c0_43] : memref<1x1xf32, #tpu.memory_space<vmem>>, vector<1x1xf32>
        tpu.vector_store %arg4[%c0_42, %c0_43], %106 {strides = array<i32>} : memref<1x1xf32, #tpu.memory_space<vmem>>, vector<1x1xf32>,
      } else {
      }
    } else {
    }
    return
  }
  func.func @transform_0(%arg0: i32, %arg1: i32) -> (i32, i32) {
    %c0_i32 = arith.constant 0 : i32
    %c0_i32_0 = arith.constant 0 : i32
    return %arg1, %c0_i32 : i32, i32
  }
  func.func @transform_1(%arg0: i32, %arg1: i32) -> (i32, i32) {
    %c0_i32 = arith.constant 0 : i32
    %c0_i32_0 = arith.constant 0 : i32
    return %arg1, %c0_i32 : i32, i32
  }
  func.func @transform_2(%arg0: i32, %arg1: i32) -> (i32, i32) {
    %c0_i32 = arith.constant 0 : i32
    %c0_i32_0 = arith.constant 0 : i32
    %c0_i32_1 = arith.constant 0 : i32
    return %c0_i32, %c0_i32_0 : i32, i32
  }
}

</mosaic_0001>

<bundles_post_ra>
// kernel: tpu_custom_call.1
= control target key start
LH: loop header
LB: loop body
LE: loop exit
PB: predicated region body
PF: predicated region fallthrough
CT: control target
= control target key end

     0   :  { %7 = vsyncpa [#allocation8], 0  ;;  %s844_s9 = smov 0   ;;  %s846_s10 = smov 0   ;;  %s935_s0 = inlined_call_operand.vmem [shape: f32[8,32], index: 0, kind: input, shape index: {}]   ;;  %s936_s1 = inlined_call_operand.vmem [shape: f32[8,4], index: 1, kind: input, shape index: {}]   ;;  %s937_s2 = inlined_call_operand.hbm [shape: f32[1,1], index: 2, kind: output, shape index: {}]  }
   0x1   :  { %s848_s11 = smov 0  }
   0x2 LB: > { %s674_s12 = sadd.s32 4294967295, %s818_s11   ;;  %s25_s13 = sadd.s32 1, %s814_s10  ;;  %s818_s11 = sphi %s848_s11, %s13_s11   ;;  %s814_s10 = sphi %s846_s10, %s940_s10   ;;  %s810_s9 = sphi %s844_s9, %s939_s9  }
   0x3   : > { %p27_p0 = scmp.ge.s32.totalorder %s25_s13, 2  ;;  %p678_p1 = scmp.ge.s32.totalorder %s818_s11, 1 }
   0x4   : > { %p128_p2 = scmp.lt.s32.totalorder %s818_s11, 3 }
   0x5   : > { %s942_s13 = smov (%p27_p0, %s25_s13), 0 }
   0x6   : > { %p129_p3 = pnand %p678_p1, %p128_p2 }
   0x7   : > { %v868_v0 = vld [vmem:[%s935_s0] sm:$0xff] (!%p129_p3)  ;;  %p679_p4 = scmp.ne.s32.totalorder (!%p129_p3), %s810_s9, 0 }
   0x8   : > { %132 = sbr.rel (%p129_p3) target bundleno = 831 (0x33f), region = 28  ;;  %v873_v1 = vld [vmem:[%s936_s1] sm:$0xff] (!%p129_p3) }
   0xf   : > { %161 = sbr.rel (%p679_p4) target bundleno = 361 (0x169), region = 32  ;;  %vm168_vm0 = vcmask (!%p679_p4), 24576   ;;  %vm170_vm1 = vcmask (!%p679_p4), 0   ;;  %vm172_vm2 = vcmp.ge.f32.partialorder (!%p679_p4), %v873_v1, 0.8  ;;  %v820_v2 = vmov (!%p679_p4), 0.0  }
  0x10   : > { %v680_v3 = vsel (!%p679_p4), %vm172_vm2, 1.0, %v820_v2  ;;  %vm176_vm3 = vcmask (!%p679_p4), 31744   ;;  %169 = vst.msk [vmem:[#allocation3] sm:$0x1] (!%p679_p4), %vm168_vm0, %v820_v2  ;;  %699 = vmatprep.subr.mxu0 (!%p679_p4), %v820_v2  ;;  %vm821_vm4 = vmmov (!%p679_p4), 0   ;;  %vm166_vm5 = vcmask (!%p679_p4), 257024  }
  0x11   : > { %171 = vst.msk [vmem:[#allocation6] sm:$0x1] (!%p679_p4), %vm170_vm1, %v820_v2  ;;  %188 = vxpose.xlu0.b32.start.end [1/1] (short) (narrow) (!%p679_p4), %v680_v3, 8  ;;  %v177_v4 = vsel (!%p679_p4), %vm176_vm3, %v680_v3, 0.0  ;;  %700 = vmatpush3.msra.mxu0 (!%p679_p4), %v868_v0  ;;  %vm220_vm6 = vcmask (!%p679_p4), 64512  }
  0x12   : > { %v178_v5 = vrot.slane (!%p679_p4), %v177_v4, 4  ;;  %701 = vmatprep.mubr.msk.f32.mxu0 (!%p679_p4), %vm821_vm4, %v820_v2  ;;  %167 = vst.msk [vmem:[#allocation2] sm:$0xf] (!%p679_p4), %vm166_vm5, %v820_v2 }
  0x14   : > { %v179_v6 = vadd.f32 (!%p679_p4), %v178_v5, %v177_v4 }
  0x16   : > { %v180_v7 = vrot.slane %v179_v6, 2 }
  0x17   : > { %v175_v10 = vld [vmem:[#allocation3] sm:$0x1] }
  0x18   : > { %v181_v8 = vadd.f32 %v180_v7, %v179_v6 }
  0x19   : > { %v187_v14 = vld [vmem:[#allocation2] sm:$0xf] }
  0x1a   : > { %v182_v9 = vrot.slane %v181_v8, 1 }
  0x1c   : > { %v183_v11 = vadd.f32 %v182_v9, %v181_v8 }
  0x1e   : > { %v184_v12 = vadd.f32 %v183_v11, %v175_v10 }
  0x20   : > { %186 = vst.msk [vmem:[#allocation3] sm:$0x1] %vm168_vm0, %v184_v12 }
  0x91   : > { %v204_v13 = vpop.trf.xlu0 }
  0x92   : > { %702 = vmatmul.mubr.msk.f32.vlgmr.msra.gmra.mrb[0].mxu0 %vm220_vm6, %v204_v13 }
 0x165   : > { %v290_v15 = vpop.f32.mrb[0].mxu0 }
 0x166   : > { %v294_v16 = vadd.f32 %v290_v15, %v187_v14  ;;  %v703_v17 = vpop.f32.mrb[1].mxu0 }
 0x168   : > { %296 = vst.msk [vmem:[#allocation2] sm:$0xf] %vm166_vm5, %v294_v16 }
 0x169 PF: > { %p682_p5 = scmp.ne.s32.totalorder %s810_s9, 1 }
 0x16a   : > { %vm311_vm7 = vcmask (!%p682_p5), 261120   ;;  %v489_v19 = vmul.f32 (!%p682_p5), %v868_v0, %v868_v0  ;;  %v822_v20 = vmov (!%p682_p5), 0.0   ;;  %vm823_vm8 = vmmov (!%p682_p5), 0   ;;  %v301_v22 = vld [vmem:[#allocation3] sm:$0x1] (!%p682_p5) }
 0x16b   : > { %300 = sbr.rel (%p682_p5) target bundleno = 806 (0x326), region = 40  ;;  %704 = vmatprep.subr.mxu0 (!%p682_p5), %v822_v20  ;;  %706 = vmatprep.mubr.msk.f32.mxu0 (!%p682_p5), %vm823_vm8, %v822_v20  ;;  %v302_v24 = vmax.f32 (!%p682_p5), %v301_v22, 1.0  ;;  %vm305_vm9 = vcmp.gt.f32.partialorder (!%p682_p5), %v301_v22, 0.0  ;;  %v387_v25 = vlaneseq (!%p682_p5)  ;;  %v824_v26 = vmov (!%p682_p5), 0  }
 0x16c   : > { %709 = vmatprep.subr.mxu1 (!%p682_p5), %v822_v20  ;;  %v490_v23 = vsel (!%p682_p5), %vm311_vm7, %v489_v19, 0.0  ;;  %711 = vmatprep.mubr.msk.f32.mxu1 (!%p682_p5), %vm823_vm8, %v822_v20  ;;  %v565_v27 = vsel (!%p682_p5), %vm305_vm9, 1, %v824_v26  ;;  %v825_v28 = vmov (!%p682_p5), 1   ;;  %v826_v34 = vmov (!%p682_p5), 2  }
 0x16d   : > { %491 = vadd.xlane.f32.xlu0 (!%p682_p5), %v490_v23  ;;  %754 = vset.pattern.permute.xlu1 (!%p682_p5), %v825_v28  ;;  %758 = vrcp.f32 (!%p682_p5), %v302_v24  ;;  %v388_v29 = vshrl.u32 (!%p682_p5), %v387_v25, 7  ;;  %v827_v35 = vmov (!%p682_p5), 3   ;;  %vm564_vm11 = vcmp.lt.f32.partialorder (!%p682_p5), %v873_v1, 0.2 }
 0x16e   : > { %753 = vset.pattern.permute.xlu0 (!%p682_p5), %v824_v26  ;;  %vm495_vm13 = vcmask (!%p682_p5), 31744   ;;  %v390_v39 = vand.u32 (!%p682_p5), 127, %v387_v25  ;;  %vm385_vm14 = vcmask (!%p682_p5), 27648   ;;  %vm402_vm0 = vcmask (!%p682_p5), 24576  }
 0x16f   : > { %v310_v18 = vld [vmem:[#allocation2] sm:$0xf] (!%p682_p5)  ;;  %v485_v30 = vsub.s32 (!%p682_p5), 0, %v388_v29  ;;  %v517_v50 = vsub.s32 (!%p682_p5), 1, %v388_v29  ;;  %v527_v51 = vsub.s32 (!%p682_p5), 2, %v388_v29  ;;  %v537_v55 = vsub.s32 (!%p682_p5), 3, %v388_v29 }
 0x170   : > { %v404_v21 = vld [vmem:[#allocation2] sm:$0xf] (!%p682_p5)  ;;  %705 = vmatpush3.xpose.msk.msra.mxu0 (!%p682_p5), %vm311_vm7, %v310_v18  ;;  %vm391_vm15 = vcmp.eq.s32.totalorder (!%p682_p5), %v388_v29, %v390_v39  ;;  %vm593_vm1 = vcmask (!%p682_p5), 0  }
 0x171   : > { %710 = vmatpush3.xpose.msk.msra.mxu1 (!%p682_p5), %vm311_vm7, %v404_v21  ;;  %v569_v36 = vrot.slane (!%p682_p5), %v565_v27, %v485_v30 }
 0x173   : > { %707 = vmatmul.mubr.msk.f32.vlgmr.msra.gmra.mrb[0].mxu0 %vm311_vm7, %v310_v18  ;;  %vm570_vm10 = vcmp.eq.s32.totalorder %v569_v36, 1 }
 0x174   : > { %712 = vmatmul.mubr.msk.f32.vlgmr.msra.gmra.mrb[0].mxu1 %vm311_vm7, %v868_v0  ;;  %vm571_vm12 = vmand %vm564_vm11, %vm570_vm10 }
 0x175   : > { %v688_v37 = vsel %vm571_vm12, 1.0, %v822_v20 }
 0x176   : > { %v574_v38 = vsel %vm495_vm13, %v688_v37, 0.0 }
 0x177   : > { %v759_v31 = vpop.eup %758 }
 0x178   : > { %v486_v32 = vrot.slane %v759_v31, %v485_v30 }
 0x17a   : > { %v493_v33 = vmul.f32 %v486_v32, %v873_v1 }
 0x17c   : > { %512 = vperm.xlu1 %754, %v493_v33  }
 0x180   : > { %755 = vset.pattern.permute.xlu1 %v826_v34 }
 0x181   : > { %522 = vperm.xlu1 %755, %v493_v33  }
 0x183   : > { %502 = vperm.xlu0 %753, %v493_v33  }
 0x185   : > { %756 = vset.pattern.permute.xlu1 %v827_v35 }
 0x186   : > { %532 = vperm.xlu1 %756, %v493_v33  }
 0x187   : > { %757 = vset.pattern.permute.xlu0 %v827_v35 }
 0x1a2   : > { %575 = vadd.xlane.f32.xlu0 %v574_v38 }
 0x1fa   : > { %v492_v48 = vpop.xlane.xlu0 %491 }
 0x1fb   : > { %v513_v41 = vpop.permute.xlu1 %512 }
 0x200   : > { %v523_v53 = vpop.permute.xlu1 %522 }
 0x202   : > { %v503_v58 = vpop.permute.xlu0 %502 }
 0x205   : > { %v533_v3 = vpop.permute.xlu1 %532 }
 0x22f   : > { %v576_v28 = vpop.xlane.xlu0 %575 }
 0x230   : > { %v581_v29 = vmax.f32 %v576_v28, 1.0 }
 0x246   : > { %v381_v40 = vpop.f32.mrb[0].mxu0 }
 0x247   : > { %386 = vst.msk [vmem:[#allocation4] sm:$0xf] %vm385_vm14, %v381_v40  ;;  %v392_v42 = vsel %vm391_vm15, %v381_v40, 0.0  ;;  %v708_v43 = vpop.f32.mrb[1].mxu0  ;;  %v478_v44 = vpop.f32.mrb[0].mxu1 }
 0x248   : > { %v393_v45 = vsel %vm385_vm14, %v392_v42, 0.0  ;;  %v713_v46 = vpop.f32.mrb[1].mxu1  ;;  %v488_v9 = vmul.f32 %v486_v32, %v478_v44  ;;  %v585_v43 = vld [vmem:[#allocation6] sm:$0x1] }
 0x249   : > { %v394_v47 = vrot.slane %v393_v45, 4 }
 0x24a   : > { %v494_v13 = vmul.f32 %v488_v9, %v873_v1 }
 0x24b   : > { %v395_v49 = vadd.f32 %v394_v47, %v393_v45 }
 0x24c   : > { %v496_v15 = vsel %vm495_vm13, %v494_v13, 0.0 }
 0x24d   : > { %v396_v52 = vrot.slane %v395_v49, 2 }
 0x24e   : > { %v499_v54 = vld [vmem:[#allocation4] sm:$0xf] }
 0x24f   : > { %v397_v56 = vadd.f32 %v396_v52, %v395_v49  ;;  %v518_v57 = vrot.slane %v499_v54, %v517_v50  ;;  %v528_v59 = vrot.slane %v499_v54, %v527_v51  ;;  %v508_v60 = vrot.slane %v499_v54, %v485_v30 }
 0x250   : > { %v538_v63 = vrot.slane %v499_v54, %v537_v55 }
 0x251   : > { %v398_v61 = vrot.slane %v397_v56, 1  ;;  %v519_v62 = vmul.f32 %v518_v57, %v513_v41  ;;  %v509_v0 = vmul.f32 %v508_v60, %v503_v58  ;;  %v529_v4 = vmul.f32 %v528_v59, %v523_v53 }
 0x252   : > { %v539_v7 = vmul.f32 %v538_v63, %v533_v3 }
 0x253   : > { %v399_v2 = vadd.f32 %v398_v61, %v397_v56  ;;  %v520_v5 = vadd.f32 %v519_v62, %v509_v0 }
 0x255   : > { %v400_v6 = vmul.f32 %v759_v31, %v399_v2  ;;  %v530_v8 = vadd.f32 %v529_v4, %v520_v5 }
 0x257   : > { %v401_v10 = vmul.f32 %v759_v31, %v400_v6  ;;  %v540_v11 = vadd.f32 %v539_v7, %v530_v8 }
 0x259   : > { %403 = vst.msk [vmem:[#allocation5] sm:$0x1] %vm402_vm0, %v401_v10  ;;  %v541_v12 = vmul.f32 %v540_v11, %v493_v33 }
 0x25b   : > { %v542_v14 = vsel %vm495_vm13, %v541_v12, 0.0 }
 0x25c   : > { %543 = vadd.xlane.f32.xlu1 %v542_v14 }
 0x260   : > { %v687_v16 = vld [vmem:[#allocation5] ss:$0 sm:$0xff]  ;;  %497 = vadd.xlane.f32.xlu1 %v496_v15 }
 0x261   : > { %v557_v17 = vmul.f32 %v687_v16, %v492_v48 }
 0x263   : > { %v558_v18 = vmax.f32 %v557_v17, 1e-16 }
 0x265   : > { %760 = vrsqrt.f32 %v558_v18 }
 0x26f   : > { %v761_v19 = vpop.eup %760 }
 0x270   : > { %v560_v20 = vmul.f32 %v761_v19, %v488_v9 }
 0x272   : > { %v561_v21 = vsub.f32 1.0, %v560_v20 }
 0x274   : > { %v562_v22 = vsub.f32 0.3, %v561_v21 }
 0x276   : > { %v563_v23 = vmax.f32 %v562_v22, 0.0 }
 0x278   : > { %v577_v24 = vmul.f32 %v688_v37, %v563_v23 }
 0x27a   : > { %v578_v25 = vsel %vm495_vm13, %v577_v24, 0.0 }
 0x27b   : > { %579 = vadd.xlane.f32.xlu1 %v578_v25 }
 0x2e9   : > { %v544_v1 = vpop.xlane.xlu1 %543 }
 0x2ea   : > { %v545_v26 = vmul.f32 %v544_v1, %v492_v48 }
 0x2ec   : > { %v546_v27 = vmax.f32 %v545_v26, 1e-16 }
 0x2ed   : > { %v498_v31 = vpop.xlane.xlu1 %497 }
 0x2ee   : > { %762 = vrsqrt.f32 %v546_v27 }
 0x2ef   : > { %764 = vrcp.f32 %v581_v29 }
 0x2f8   : > { %v763_v30 = vpop.eup %762 }
 0x2f9   : > { %v548_v32 = vmul.f32 %v763_v30, %v498_v31  ;;  %v765_v33 = vpop.eup %764 }
 0x2fb   : > { %v549_v35 = vsub.f32 1.0, %v548_v32 }
 0x308   : > { %v580_v34 = vpop.xlane.xlu1 %579 }
 0x309   : > { %v583_v36 = vmul.f32 %v765_v33, %v580_v34 }
 0x30b   : > { %v584_v38 = vadd.f32 %v583_v36, %v549_v35 }
 0x30d   : > { %v586_v39 = vrot.slane %v584_v38, 4 }
 0x30f   : > { %v587_v37 = vadd.f32 %v586_v39, %v584_v38 }
 0x311   : > { %v588_v40 = vrot.slane %v587_v37, 2 }
 0x313   : > { %v589_v41 = vadd.f32 %v588_v40, %v587_v37 }
 0x315   : > { %v590_v42 = vrot.slane %v589_v41, 1 }
 0x317   : > { %v591_v44 = vadd.f32 %v590_v42, %v589_v41 }
 0x319   : > { %v592_v45 = vadd.f32 %v591_v44, %v585_v43 }
 0x31b   : > { %594 = vst.msk [vmem:[#allocation6] sm:$0x1] %vm593_vm1, %v592_v45 }
 0x322   : > { %v598_v46 = vld [vmem:[#allocation6] sm:$0x1] }
 0x323   : > { %v599_v47 = vmul.f32 0.125, %v598_v46 }
 0x325   : > { %600 = vst.msk [vmem:[#allocation7] sm:$0x1] %vm593_vm1, %v599_v47 }
 0x326 PF: > { %p900_p6 = scmp.eq.s32.totalorder %s674_s12, 1  ;;  %s828_s19 = smov [#allocation7]  }
 0x327   : > { %s608_s20 = sshll.u32 %s828_s19, 4  ;;  %s609_s20 = int_to_ptr.vmem [resolvable:$true] %s608_s20 }
 0x328   : > { %s766_s21 = scalar_lea.vmem %s609_s20, 16  ;;  %s772_s22 = scalar_lea.vmem %s609_s20, 32 }
 0x329   : > { %p767_p7 = scmp.ne.s32.totalorder %s609_s20, %s766_s21  ;;  %p773_p10 = scmp.lt.s32.totalorder %s609_s20, %s609_s20 }
 0x32a   : > { %p774_p11 = scmp.lt.s32.totalorder %s772_s22, %s766_s21 }
 0x32b   : > { %p768_p8 = pnand %p767_p7, %p900_p6 }
 0x32c   : > { %p775_p12 = por %p774_p11, %p773_p10 }
 0x32d   : > { %p769_p9 = pneg %p768_p8 }
 0x32f   : > { %p776_p13 = pnand %p775_p12, %p769_p9 }
 0x331   : > { %779 = shalt.err (!%p776_p13)
}
 0x332   : > { %s780_s25 = scalar_lea.hbm %s937_s2, 16 }
 0x333   : > { %p781_p0 = scmp.ne.s32.totalorder %s937_s2, %s780_s25  ;;  %p786_p3 = scmp.lt.u32.totalorder %s780_s25, %s937_s2 }
 0x335   : > { %p782_p1 = pnand %p781_p0, %p900_p6 }
 0x337   : > { %p783_p2 = pneg %p782_p1 }
 0x339   : > { %p788_p4 = pnand %p786_p3, %p783_p2 }
 0x33b   : > { %791 = shalt.err (!%p788_p4)
}
 0x33c   : > { %715 = dma.vmem_to_hbm [thread:$0]  (%p900_p6), %s609_s20, 16, %s937_s2, [#allocation8]  }
 0x33d   : > { %805 = dma.done.wait (%p900_p6), [#allocation8], 16  }
 0x33e   : > { %807 = vsyncadd (%p900_p6), [#allocation8], 4294967280 }
 0x33f PF: > { %s13_s11 = sadd.s32 1, %s818_s11   ;;  %s939_s9 = smov %s814_s10 }
 0x340   : > { %p10_p5 = scmp.ge.s32.totalorder %s13_s11, 4   ;;  %s940_s10 = smov %s942_s13 }
 0x342   :  { %12 = sbr.rel (!%p10_p5) target bundleno = 2 (0x2), region = 78 }
 0x349   :  { %621 = vsyncpa [#allocation8], 1 }
 0x34a   :  { %623 = vsyncpa [#allocation8 + $0x1], 1 }

</bundles_post_ra>
